<compile_context>
chip_gen: v6e
topology: v6e:2x2x1
jax: 0.10.0
libtpu: 0.0.40
codegen_flags: <defaults>
</compile_context>

<pallas_src>
import jax
import jax.numpy as jnp
from jax.experimental import pallas as pl
from jax.experimental.pallas import tpu as pltpu

LANES = 128


# ----------------------------- Pallas kernel --------------------------------
def _pointnet_encoder_kernel(
    x_ref,        # (TB*N, in_dim+1)   points + ones channel (bias fold)
    w1_ref,       # (in_dim+1, d0)     conv1 with BN + bias folded in
    w2_ref,       # (d0, d1)           conv2 with BN folded in
    wh1_ref,      # (d1, 2*d0)         fused [mu|var] head layer 1
    wh2_ref,      # (2*d0, 128)        block-diag fused head layer 2, lane-padded
    bias_ref,     # (8, 128)           row0: bias2, row1: head1 bias, row2: head2 bias
    out_ref,      # (TB, 128)          [mu | var | zero-pad] per cloud
):
    TB = out_ref.shape[0]
    d1 = w2_ref.shape[1]
    two_d0 = wh1_ref.shape[1]
    N = x_ref.shape[0] // TB

    # --- point_proj layer 1: Conv1d(k=1)+BN+bias folded -> ReLU ---
    h = jnp.maximum(
        jnp.dot(x_ref[...], w1_ref[...], preferred_element_type=jnp.float32),
        0.0)                                                   # (TB*N, d0)

    # --- point_proj layer 2: Conv1d(k=1)+BN folded -> ReLU ---
    h = jnp.dot(h, w2_ref[...], preferred_element_type=jnp.float32) \
        + bias_ref[0:1, :d1]
    h = jnp.maximum(h, 0.0)                                    # (TB*N, d1)

    # --- torch.max over points (per point cloud) ---
    g = jnp.max(h.reshape(TB, N, d1), axis=1)                  # (TB, d1)

    # --- fused mu|var heads, layer 1: Linear -> ReLU ---
    z = jnp.dot(g, wh1_ref[...], preferred_element_type=jnp.float32) \
        + bias_ref[1:2, :two_d0]
    z = jnp.maximum(z, 0.0)                                    # (TB, 2*d0)

    # --- fused block-diagonal layer 2, one lane-dense 128-wide store ---
    out_ref[...] = jnp.dot(z, wh2_ref[...],
                           preferred_element_type=jnp.float32) + bias_ref[2:3, :]


# ------------------------------ host wrapper ---------------------------------
def pointnet_encoder_forward(x, params, *, tb=8):
    """x: (B, N, in_dim) f32. Returns (mu, var), each (B, 1, out_dim)."""
    B, N, in_dim = x.shape
    d0 = params["w1"].shape[1]
    d1 = params["w2"].shape[1]
    out_dim = params["wm2"].shape[1]
    assert 2 * out_dim <= LANES, "fused mu|var output must fit in 128 lanes"
    assert tb % 8 == 0, "TB must be a multiple of 8 for (8,128) output tiling"

    # ---- host-side folding: BN -> conv weights, bias1 -> ones channel ----
    w1_eff = params["w1"] * params["s1"]                      # (in_dim, d0)
    b1_eff = params["b1"] * params["s1"] + params["t1"]       # (1, d0)
    w1a = jnp.concatenate([w1_eff, b1_eff], axis=0)           # (in_dim+1, d0)

    w2_eff = params["w2"] * params["s2"]                      # (d0, d1)
    b2_eff = params["b2"] * params["s2"] + params["t2"]       # (1, d1)

    # ---- fuse mu/var heads ----
    wh1 = jnp.concatenate([params["wm1"], params["wv1"]], axis=1)   # (d1, 2*d0)
    bh1 = jnp.concatenate([params["bm1"], params["bv1"]], axis=1)   # (1, 2*d0)

    wh2 = jnp.zeros((2 * d0, LANES), jnp.float32)             # block-diag, lane-padded
    wh2 = wh2.at[:d0, :out_dim].set(params["wm2"])
    wh2 = wh2.at[d0:, out_dim:2 * out_dim].set(params["wv2"])
    bh2 = jnp.zeros((1, LANES), jnp.float32)
    bh2 = bh2.at[:, :out_dim].set(params["bm2"])
    bh2 = bh2.at[:, out_dim:2 * out_dim].set(params["bv2"])

    # ---- pack remaining bias vectors into one (8,128) block ----
    bpack = jnp.zeros((8, LANES), jnp.float32)
    bpack = bpack.at[0, :d1].set(b2_eff[0])
    bpack = bpack.at[1, :2 * d0].set(bh1[0])
    bpack = bpack.at[2, :].set(bh2[0])

    # ---- batch tiling: TB clouds per grid step, pad B up to a multiple of TB ----
    grid_b = pl.cdiv(B, tb)
    B_pad = grid_b * tb
    ones = jnp.ones((B, N, 1), jnp.float32)
    x_aug = jnp.concatenate([x, ones], axis=-1)               # (B, N, in_dim+1)
    if B_pad != B:
        x_aug = jnp.pad(x_aug, ((0, B_pad - B), (0, 0), (0, 0)))
    x_flat = x_aug.reshape(B_pad * N, in_dim + 1)             # host-side flatten

    def bcast_spec(arr):
        nd = arr.ndim
        return pl.BlockSpec(arr.shape, lambda b, _nd=nd: (0,) * _nd)

    out = pl.pallas_call(
        _pointnet_encoder_kernel,
        out_shape=jax.ShapeDtypeStruct((B_pad, LANES), jnp.float32),
        grid=(grid_b,),
        in_specs=[
            pl.BlockSpec((tb * N, in_dim + 1), lambda b: (b, 0)),
            bcast_spec(w1a),
            bcast_spec(w2_eff),
            bcast_spec(wh1),
            bcast_spec(wh2),
            bcast_spec(bpack),
        ],
        out_specs=pl.BlockSpec((tb, LANES), lambda b: (b, 0)),
        compiler_params=pltpu.CompilerParams(
            dimension_semantics=("parallel",)),
    )(x_flat, w1a, w2_eff, wh1, wh2, bpack)

    mu = out[:B, :out_dim][:, None, :]
    var = out[:B, out_dim:2 * out_dim][:, None, :]
    return mu, var


# ----------------------- deterministic parameter init ------------------------
def init_params(key, in_dim, layer_dims, out_dim):
    d0, d1 = layer_dims
    keys = jax.random.split(key, 14)
    eps = 1e-5

    def bn_affine(kg, kb, km, kv, dim):
        gamma = 1.0 + 0.1 * jax.random.normal(kg, (1, dim), jnp.float32)
        beta = 0.1 * jax.random.normal(kb, (1, dim), jnp.float32)
        mean = 0.1 * jax.random.normal(km, (1, dim), jnp.float32)
        var = 1.0 + 0.1 * jax.random.uniform(kv, (1, dim), jnp.float32)
        scale = gamma / jnp.sqrt(var + eps)           # eval-mode BN folded
        shift = beta - scale * mean
        return scale, shift

    s1, t1 = bn_affine(keys[0], keys[1], keys[2], keys[3], d0)
    s2, t2 = bn_affine(keys[4], keys[5], keys[6], keys[7], d1)

    p = {
        # point_proj (Conv1d k=1 weights stored transposed: (C_in, C_out))
        "w1": 0.1 * jax.random.normal(keys[8], (in_dim, d0), jnp.float32),
        "b1": 0.1 * jax.random.normal(keys[9], (1, d0), jnp.float32),
        "s1": s1, "t1": t1,
        "w2": 0.1 * jax.random.normal(keys[10], (d0, d1), jnp.float32),
        "b2": 0.1 * jax.random.normal(keys[11], (1, d1), jnp.float32),
        "s2": s2, "t2": t2,
        # mu head: Linear(d1 -> d0) -> ReLU -> Linear(d0 -> out_dim)
        "wm1": 0.1 * jax.random.normal(keys[12], (d1, d0), jnp.float32),
        "bm1": jnp.full((1, d0), 0.01, jnp.float32),
        "wm2": 0.1 * jax.random.normal(keys[13], (d0, out_dim), jnp.float32),
        "bm2": jnp.full((1, out_dim), -0.02, jnp.float32),
        # var head (same architecture, deterministically different values)
        "wv1": 0.1 * jax.random.normal(keys[13], (d1, d0), jnp.float32) + 0.01,
        "bv1": jnp.full((1, d0), -0.01, jnp.float32),
        "wv2": 0.1 * jax.random.normal(keys[12], (d0, out_dim), jnp.float32) + 0.02,
        "bv2": jnp.full((1, out_dim), 0.03, jnp.float32),
    }
    return p


# ------------------------------ pure-JAX reference ---------------------------
def ref_forward(x, p):
    h = jnp.einsum("bnc,cd->bnd", x, p["w1"]) + p["b1"]
    h = jnp.maximum(h * p["s1"] + p["t1"], 0.0)
    h = jnp.einsum("bnc,cd->bnd", h, p["w2"]) + p["b2"]
    h = jnp.maximum(h * p["s2"] + p["t2"], 0.0)
    g = jnp.max(h, axis=1)                                  # (B, D1)
    m = jnp.maximum(g @ p["wm1"] + p["bm1"], 0.0) @ p["wm2"] + p["bm2"]
    v = jnp.maximum(g @ p["wv1"] + p["bv1"], 0.0) @ p["wv2"] + p["bv2"]
    return m[:, None, :], v[:, None, :]


if __name__ == "__main__":
    B, N = 16, 16                # 16 point clouds, 16 points each
    in_dim = 3                   # xyz
    layer_dims = [32, 64]
    out_dim = 16

    key = jax.random.PRNGKey(0)
    kx, kp = jax.random.split(key)
    x = jax.random.normal(kx, (B, N, in_dim), jnp.float32)
    params = init_params(kp, in_dim, layer_dims, out_dim)

    mu, var = pointnet_encoder_forward(x, params, tb=8)   # grid=(2,) -> both v7x TCs
    jax.block_until_ready((mu, var))

    mu_ref, var_ref = ref_forward(x, params)
    assert mu.shape == (B, 1, out_dim) and var.shape == (B, 1, out_dim)
    assert jnp.allclose(mu, mu_ref, atol=2e-5, rtol=2e-5), \
        float(jnp.max(jnp.abs(mu - mu_ref)))
    assert jnp.allclose(var, var_ref, atol=2e-5, rtol=2e-5), \
        float(jnp.max(jnp.abs(var - var_ref)))

    print("KERNEL_OK")
</pallas_src>

<mosaic_0001>
module attributes {stable_mosaic.version = 11 : i64} {
  func.func @_pointnet_encoder_kernel(%arg0: i32, %arg1: memref<128x4xf32, #tpu.memory_space<vmem>>, %arg2: memref<4x32xf32, #tpu.memory_space<vmem>>, %arg3: memref<32x64xf32, #tpu.memory_space<vmem>>, %arg4: memref<64x64xf32, #tpu.memory_space<vmem>>, %arg5: memref<64x128xf32, #tpu.memory_space<vmem>>, %arg6: memref<8x128xf32, #tpu.memory_space<vmem>>, %arg7: memref<8x128xf32, #tpu.memory_space<vmem>>) attributes {dimension_semantics = [#tpu.dimension_semantics<parallel>], iteration_bounds = array<i64: 2>, scalar_prefetch = 0 : i64, scratch_operands = 0 : i64, tpu.core_type = #tpu.core_type<tc>, window_params = [{transform_indices = @transform_0, window_bounds = array<i64: 128, 4>}, {pipeline_mode = #tpu.pipeline_mode<synchronous>, transform_indices = @transform_1, window_bounds = array<i64: 4, 32>}, {pipeline_mode = #tpu.pipeline_mode<synchronous>, transform_indices = @transform_2, window_bounds = array<i64: 32, 64>}, {pipeline_mode = #tpu.pipeline_mode<synchronous>, transform_indices = @transform_3, window_bounds = array<i64: 64, 64>}, {pipeline_mode = #tpu.pipeline_mode<synchronous>, transform_indices = @transform_4, window_bounds = array<i64: 64, 128>}, {pipeline_mode = #tpu.pipeline_mode<synchronous>, transform_indices = @transform_5, window_bounds = array<i64: 8, 128>}, {transform_indices = @transform_6, window_bounds = array<i64: 8, 128>}]} {
    %c0 = arith.constant 0 : index
    %c0_0 = arith.constant 0 : index
    %0 = vector.load %arg1[%c0, %c0_0] : memref<128x4xf32, #tpu.memory_space<vmem>>, vector<128x4xf32>
    %c0_1 = arith.constant 0 : index
    %c0_2 = arith.constant 0 : index
    %1 = vector.load %arg2[%c0_1, %c0_2] : memref<4x32xf32, #tpu.memory_space<vmem>>, vector<4x32xf32>
    %cst = arith.constant dense<0.000000e+00> : vector<128x32xf32>
    %2 = tpu.matmul %0, %1, %cst {dimension_numbers = #tpu.dot_dimension_numbers<[1], [0], [0], [1], [0, 0, 1, 1], [], []>} : vector<128x4xf32>, vector<4x32xf32>, vector<128x32xf32> -> vector<128x32xf32>
    %cst_3 = arith.constant 0.000000e+00 : f32
    %3 = vector.broadcast %cst_3 : f32 to vector<128x32xf32>
    %4 = arith.maximumf %2, %3 : vector<128x32xf32>
    %c0_4 = arith.constant 0 : index
    %c0_5 = arith.constant 0 : index
    %5 = vector.load %arg3[%c0_4, %c0_5] : memref<32x64xf32, #tpu.memory_space<vmem>>, vector<32x64xf32>
    %cst_6 = arith.constant dense<0.000000e+00> : vector<128x64xf32>
    %6 = tpu.matmul %4, %5, %cst_6 {dimension_numbers = #tpu.dot_dimension_numbers<[1], [0], [0], [1], [0, 0, 1, 1], [], []>} : vector<128x32xf32>, vector<32x64xf32>, vector<128x64xf32> -> vector<128x64xf32>
    %c0_7 = arith.constant 0 : index
    %c0_8 = arith.constant 0 : index
    %7 = vector.load %arg6[%c0_7, %c0_8] : memref<8x128xf32, #tpu.memory_space<vmem>>, vector<1x64xf32>
    %8 = vector.broadcast %7 : vector<1x64xf32> to vector<128x64xf32>
    %9 = arith.addf %6, %8 : vector<128x64xf32>
    %cst_9 = arith.constant 0.000000e+00 : f32
    %10 = vector.broadcast %cst_9 : f32 to vector<128x64xf32>
    %11 = arith.maximumf %9, %10 : vector<128x64xf32>
    %12 = vector.shape_cast %11 : vector<128x64xf32> to vector<8x16x64xf32>
    %cst_10 = arith.constant dense<0xFF800000> : vector<8x64xf32>
    %13 = vector.multi_reduction <maximumf>, %12, %cst_10 [1] : vector<8x16x64xf32> to vector<8x64xf32>
    %c0_11 = arith.constant 0 : index
    %c0_12 = arith.constant 0 : index
    %14 = vector.load %arg4[%c0_11, %c0_12] : memref<64x64xf32, #tpu.memory_space<vmem>>, vector<64x64xf32>
    %cst_13 = arith.constant dense<0.000000e+00> : vector<8x64xf32>
    %15 = tpu.matmul %13, %14, %cst_13 {dimension_numbers = #tpu.dot_dimension_numbers<[1], [0], [0], [1], [0, 0, 1, 1], [], []>} : vector<8x64xf32>, vector<64x64xf32>, vector<8x64xf32> -> vector<8x64xf32>
    %c1 = arith.constant 1 : index
    %c0_14 = arith.constant 0 : index
    %16 = vector.load %arg6[%c1, %c0_14] : memref<8x128xf32, #tpu.memory_space<vmem>>, vector<1x64xf32>
    %17 = vector.broadcast %16 : vector<1x64xf32> to vector<8x64xf32>
    %18 = arith.addf %15, %17 : vector<8x64xf32>
    %cst_15 = arith.constant 0.000000e+00 : f32
    %19 = vector.broadcast %cst_15 : f32 to vector<8x64xf32>
    %20 = arith.maximumf %18, %19 : vector<8x64xf32>
    %c0_16 = arith.constant 0 : index
    %c0_17 = arith.constant 0 : index
    %21 = vector.load %arg5[%c0_16, %c0_17] : memref<64x128xf32, #tpu.memory_space<vmem>>, vector<64x128xf32>
    %cst_18 = arith.constant dense<0.000000e+00> : vector<8x128xf32>
    %22 = tpu.matmul %20, %21, %cst_18 {dimension_numbers = #tpu.dot_dimension_numbers<[1], [0], [0], [1], [0, 0, 1, 1], [], []>} : vector<8x64xf32>, vector<64x128xf32>, vector<8x128xf32> -> vector<8x128xf32>
    %c2 = arith.constant 2 : index
    %c0_19 = arith.constant 0 : index
    %23 = vector.load %arg6[%c2, %c0_19] : memref<8x128xf32, #tpu.memory_space<vmem>>, vector<1x128xf32>
    %24 = vector.broadcast %23 : vector<1x128xf32> to vector<8x128xf32>
    %25 = arith.addf %22, %24 : vector<8x128xf32>
    %c0_20 = arith.constant 0 : index
    %c0_21 = arith.constant 0 : index
    %26 = vector.load %arg7[%c0_20, %c0_21] : memref<8x128xf32, #tpu.memory_space<vmem>>, vector<8x128xf32>
    tpu.vector_store %arg7[%c0_20, %c0_21], %25 {strides = array<i32>} : memref<8x128xf32, #tpu.memory_space<vmem>>, vector<8x128xf32>,
    return
  }
  func.func @transform_0(%arg0: i32) -> (i32, i32) {
    %c0_i32 = arith.constant 0 : i32
    %c0_i32_0 = arith.constant 0 : i32
    return %arg0, %c0_i32 : i32, i32
  }
  func.func @transform_1(%arg0: i32) -> (i32, i32) {
    %c0_i32 = arith.constant 0 : i32
    %c0_i32_0 = arith.constant 0 : i32
    %c0_i32_1 = arith.constant 0 : i32
    return %c0_i32, %c0_i32_0 : i32, i32
  }
  func.func @transform_2(%arg0: i32) -> (i32, i32) {
    %c0_i32 = arith.constant 0 : i32
    %c0_i32_0 = arith.constant 0 : i32
    %c0_i32_1 = arith.constant 0 : i32
    return %c0_i32, %c0_i32_0 : i32, i32
  }
  func.func @transform_3(%arg0: i32) -> (i32, i32) {
    %c0_i32 = arith.constant 0 : i32
    %c0_i32_0 = arith.constant 0 : i32
    %c0_i32_1 = arith.constant 0 : i32
    return %c0_i32, %c0_i32_0 : i32, i32
  }
  func.func @transform_4(%arg0: i32) -> (i32, i32) {
    %c0_i32 = arith.constant 0 : i32
    %c0_i32_0 = arith.constant 0 : i32
    %c0_i32_1 = arith.constant 0 : i32
    return %c0_i32, %c0_i32_0 : i32, i32
  }
  func.func @transform_5(%arg0: i32) -> (i32, i32) {
    %c0_i32 = arith.constant 0 : i32
    %c0_i32_0 = arith.constant 0 : i32
    %c0_i32_1 = arith.constant 0 : i32
    return %c0_i32, %c0_i32_0 : i32, i32
  }
  func.func @transform_6(%arg0: i32) -> (i32, i32) {
    %c0_i32 = arith.constant 0 : i32
    %c0_i32_0 = arith.constant 0 : i32
    return %arg0, %c0_i32 : i32, i32
  }
}

</mosaic_0001>

<bundles_post_ra>
// kernel: tpu_custom_call.1
= control target key start
LH: loop header
LB: loop body
LE: loop exit
PB: predicated region body
PF: predicated region fallthrough
CT: control target
= control target key end

     0   :  { %11 = vsyncpa [#allocation3], 0  ;;  %s1634_s0 = inlined_call_operand.vmem [shape: f32[256,4], index: 0, kind: input, shape index: {}]   ;;  %s1635_s1 = inlined_call_operand.vmem [shape: f32[4,32], index: 1, kind: input, shape index: {}]   ;;  %s1636_s2 = inlined_call_operand.vmem [shape: f32[32,64], index: 2, kind: input, shape index: {}]   ;;  %s1637_s3 = inlined_call_operand.vmem [shape: f32[64,64], index: 3, kind: input, shape index: {}]   ;;  %s1638_s4 = inlined_call_operand.vmem [shape: f32[64,128], index: 4, kind: input, shape index: {}]   ;;  %s1639_s5 = inlined_call_operand.vmem [shape: f32[8,128], index: 5, kind: input, shape index: {}]   ;;  %s1640_s6 = inlined_call_operand.hbm [shape: f32[16,128], index: 6, kind: output, shape index: {}]  }
   0x1   :  { %13 = vsyncpa [#allocation3 + $0x1], 0  ;;  %s1384_s21 = smov 0   ;;  %s1386_s22 = smov 0  }
   0x2   :  { %s1388_s23 = smov 0   ;;  %s1390_s24 = smov 0  }
   0x3 LB: > { %s1405_s25 = sadd.s32 4294967295, %s1344_s24   ;;  %s1043_s26 = sadd.s32 4294967294, %s1344_s24   ;;  %s1344_s24 = sphi %s1390_s24, %s1646_s24   ;;  %s1340_s23 = sphi %s1388_s23, %s1645_s23   ;;  %s1336_s22 = sphi %s1386_s22, %s1644_s22   ;;  %s1332_s21 = sphi %s1384_s21, %s1643_s21  }
   0x4   : > { %s1409_s27 = sadd.s32 1, %s1344_s24   ;;  %s157_s28 = sadd.s32 1, %s1340_s23 }
   0x5   : > { %s154_s29 = ssub.s32 %s1344_s24, %s1409_s27  ;;  %p167_p0 = scmp.ne.s32.totalorder %s1340_s23, %s1336_s22 }
   0x6   : > { %p155_p1 = scmp.eq.s32.totalorder %s154_s29, 0  ;;  %p168_p2 = scmp.eq.s32.totalorder %s1405_s25, 1 }
   0x7   : > { %p173_p3 = scmp.ne.s32.totalorder %s1336_s22, %s1332_s21  ;;  %p174_p4 = scmp.eq.s32.totalorder %s1043_s26, 1 }
   0x8   : > { %s1420_s30 = scalar_select %p155_p1, %s1340_s23, %s157_s28  }
   0x9   : > { %p1422_p5 = por %p168_p2, %p167_p0  ;;  %p1426_p6 = por %p174_p4, %p173_p3 }
   0xa   : > { %p1046_p7 = scmp.ge.s32.totalorder %s1344_s24, 1  ;;  %p216_p8 = scmp.lt.s32.totalorder %s1344_s24, 3 }
   0xc   : > { %p217_p9 = pnand %p1046_p7, %p216_p8 }
   0xd   : > { %s1048_s11 = sshll.u32 (!%p217_p9), %s1405_s25, 4  ;;  %s243_s15 = sand.u32 (!%p217_p9), 1, %s1336_s22  }
   0xe   : > { %220 = sbr.rel (%p217_p9) target bundleno = 870 (0x366), region = 44  ;;  %p247_p10 = scmp.lt.s32.totalorder (!%p217_p9), %s1048_s11, 31 }
   0xf   : > { %s1047_s16 = sshll.u32 (!%p217_p9), %s243_s15, 3  ;;  %s1089_s19 = sshll.u32 (!%p217_p9), %s1405_s25, 7 }
  0x10   : > { %s245_s20 = scalar_lea.vmem (!%p217_p9), [#allocation2], %s1047_s16  ;;  %s1599_s9 = scalar_lea.hbm (!%p217_p9), %s1640_s6, %s1089_s19 }
  0x11   : > { %s984_s26 = sshll.u32 (!%p217_p9), %s245_s20, 4  ;;  %s971_s10 = scalar_lea.sflag (!%p217_p9), [#allocation3], %s243_s15  ;;  %s985_s26 = int_to_ptr.vmem [resolvable:$true] %s984_s26 }
  0x12   : > { %s1348_s12 = smov (!%p217_p9), [#allocation2]  }
  0x13   : > { %v268_v0 = vld [vmem:[%s1635_s1] sm:$0xf]  ;;  %vm318_vm0 = vcmask 1043456   ;;  %v486_v1 = vld [vmem:[%s1636_s2 + $0x18] sm:$0xff]  ;;  %s1648_s11 = smov (!%p247_p10, %s1048_s11), 31  ;;  %vm269_vm1 = vcmask 31744  }
  0x14   : > { %1147 = vmatprep.subr.msk.mxu0 %vm318_vm0, %v268_v0  ;;  %1173 = vmatprep.subr.mxu1 %v486_v1  ;;  %s1049_s14 = sshll.u32 %s1648_s11, 3  ;;  %v485_v18 = vld [vmem:[%s1636_s2 + $0x10] sm:$0xff]  ;;  %v484_v19 = vld [vmem:[%s1636_s2 + $0x8] sm:$0xff]  ;;  %v483_v20 = vld [vmem:[%s1636_s2] sm:$0xff]  ;;  %vm492_vm2 = vcmask 261120   ;;  %v1346_v53 = vmov 0.0  }
  0x15   : > { %1148 = vmatpush3.msk.msra.mxu0 %vm318_vm0, %v268_v0  ;;  %1174 = vmatpush3.msra.mxu1 %v486_v1  ;;  %s1442_s17 = scalar_lea.vmem %s1634_s0, %s1049_s14  ;;  %v782_v54 = vld [vmem:[%s1637_s3 + $0x38] sm:$0xff]  ;;  %v781_v55 = vld [vmem:[%s1637_s3 + $0x30] sm:$0xff]  ;;  %v780_v56 = vld [vmem:[%s1637_s3 + $0x28] sm:$0xff]  ;;  %vm1347_vm3 = vmmov 0   ;;  %vm702_vm4 = vcmask 523264   ;;  %vm796_vm5 = vcmask 1041409  }
  0x16   : > { %v252_v2 = vld [vmem:[%s1442_s17] sm:$0xff]  ;;  %v253_v3 = vld [vmem:[%s1442_s17 + $0x8] sm:$0xff]  ;;  %v254_v4 = vld [vmem:[%s1442_s17 + $0x10] sm:$0xff]  ;;  %1175 = vmatprep.subr.mxu1 %v485_v18  ;;  %1205 = vmatprep.subr.mxu0 %v1346_v53  ;;  %vm798_vm6 = vcmask 1042434   ;;  %vm800_vm7 = vcmask 1043459   ;;  %vm802_vm8 = vcmask 1044484  }
  0x17   : > { %1149 = vmatprep.mubr.msk.f32.mxu0 %vm269_vm1, %v252_v2  ;;  %v255_v5 = vld [vmem:[%s1442_s17 + $0x18] sm:$0xff]  ;;  %v256_v6 = vld [vmem:[%s1442_s17 + $0x20] sm:$0xff]  ;;  %v257_v7 = vld [vmem:[%s1442_s17 + $0x28] sm:$0xff]  ;;  %1176 = vmatpush3.msra.mxu1 %v485_v18  ;;  %vm804_vm9 = vcmask 1045509   ;;  %vm806_vm10 = vcmask 1046534   ;;  %vm808_vm11 = vcmask 1047559  }
  0x18   : > { %1150 = vmatmul.mubr.msk.f32.vlgmr.msra.gmra.mxu0 %vm269_vm1, %v253_v3  ;;  %v258_v8 = vld [vmem:[%s1442_s17 + $0x30] sm:$0xff]  ;;  %v259_v9 = vld [vmem:[%s1442_s17 + $0x38] sm:$0xff]  ;;  %v260_v10 = vld [vmem:[%s1442_s17 + $0x40] sm:$0xff]  ;;  %1177 = vmatprep.subr.mxu1 %v484_v19  ;;  %s1284_s11 = scalar_lea.vmem %s985_s26, 128  ;;  %s1288_s25 = sshll.u32 %s1348_s12, 4  ;;  %s1289_s25 = int_to_ptr.vmem [resolvable:$false] %s1288_s25 }
  0x19   : > { %1152 = vmatprep.mubr.msk.f32.mxu0 %vm269_vm1, %v254_v4  ;;  %v261_v11 = vld [vmem:[%s1442_s17 + $0x48] sm:$0xff]  ;;  %v262_v12 = vld [vmem:[%s1442_s17 + $0x50] sm:$0xff]  ;;  %v263_v13 = vld [vmem:[%s1442_s17 + $0x58] sm:$0xff]  ;;  %1178 = vmatpush3.msra.mxu1 %v484_v19  ;;  %p1285_p11 = scmp.ne.s32.totalorder %s985_s26, %s1284_s11  ;;  %s1290_s13 = scalar_lea.vmem %s1289_s25, 256 }
  0x1a   : > { %v264_v14 = vld [vmem:[%s1442_s17 + $0x60] sm:$0xff]  ;;  %v265_v15 = vld [vmem:[%s1442_s17 + $0x68] sm:$0xff]  ;;  %v266_v16 = vld [vmem:[%s1442_s17 + $0x70] sm:$0xff]  ;;  %1179 = vmatprep.subr.mxu1 %v483_v20  ;;  %1206 = vmatpush3.msra.mxu0 %v782_v54  ;;  %p1291_p0 = scmp.lt.s32.totalorder %s985_s26, %s1289_s25  ;;  %p1292_p1 = scmp.lt.s32.totalorder %s1290_s13, %s1284_s11 }
  0x1b   : > { %v267_v17 = vld [vmem:[%s1442_s17 + $0x78] sm:$0xff]  ;;  %1180 = vmatpush3.msra.mxu1 %v483_v20  ;;  %1207 = vmatprep.subr.mxu0 %v1346_v53  ;;  %v779_v57 = vld [vmem:[%s1637_s3 + $0x20] sm:$0xff]  ;;  %v777_v59 = vld [vmem:[%s1637_s3 + $0x10] sm:$0xff]  ;;  %p1286_p12 = pnand %p1285_p11, %p1422_p5 }
  0x1c   : > { %1153 = vmatmul.mubr.msk.f32.gmra.mxu0 %vm269_vm1, %v255_v5  ;;  %1224 = vmatprep.subr.mxu1 %v1346_v53  ;;  %v778_v58 = vld [vmem:[%s1637_s3 + $0x18] sm:$0xff]  ;;  %v776_v60 = vld [vmem:[%s1637_s3 + $0x8] sm:$0xff]  ;;  %v775_v61 = vld [vmem:[%s1637_s3] sm:$0xff]  ;;  %p1293_p2 = por %p1292_p1, %p1291_p0 }
  0x1d   : > { %1155 = vmatprep.mubr.msk.f32.mxu0 %vm269_vm1, %v256_v6  ;;  %1208 = vmatpush3.msra.mxu0 %v781_v55  ;;  %v890_v62 = vld [vmem:[%s1638_s4 + $0x38] sm:$0xff]  ;;  %v889_v63 = vld [vmem:[%s1638_s4 + $0x30] sm:$0xff]  ;;  %v888_v0 = vld [vmem:[%s1638_s4 + $0x28] sm:$0xff]  ;;  %p1287_p13 = pneg %p1286_p12 }
  0x1e   : > { %1209 = vmatprep.subr.mxu0 %v1346_v53  ;;  %v887_v1 = vld [vmem:[%s1638_s4 + $0x20] sm:$0xff]  ;;  %v886_v2 = vld [vmem:[%s1638_s4 + $0x18] sm:$0xff]  ;;  %v885_v3 = vld [vmem:[%s1638_s4 + $0x10] sm:$0xff] }
  0x1f   : > { %1210 = vmatpush3.msra.mxu0 %v780_v56  ;;  %v884_v4 = vld [vmem:[%s1638_s4 + $0x8] sm:$0xff]  ;;  %p1294_p3 = pnand %p1293_p2, %p1287_p13 }
  0x20   : > { %1156 = vmatmul.mubr.msk.f32.gmra.mxu0 %vm269_vm1, %v257_v7  ;;  %1211 = vmatprep.subr.mxu0 %v1346_v53 }
  0x21   : > { %1158 = vmatprep.mubr.msk.f32.mxu0 %vm269_vm1, %v258_v8  ;;  %1212 = vmatpush3.msra.mxu0 %v779_v57  ;;  %v1549_v8 = vld [vmem:[%s1639_s5] ss:$0 sm:$0xff] }
  0x22   : > { %1213 = vmatprep.subr.mxu0 %v1346_v53 }
  0x23   : > { %1214 = vmatpush3.msra.mxu0 %v778_v58 }
  0x24   : > { %1159 = vmatmul.mubr.msk.f32.gmra.mxu0 %vm269_vm1, %v259_v9  ;;  %1215 = vmatprep.subr.mxu0 %v1346_v53 }
  0x25   : > { %1161 = vmatprep.mubr.msk.f32.mxu0 %vm269_vm1, %v260_v10  ;;  %1216 = vmatpush3.msra.mxu0 %v777_v59 }
  0x26   : > { %1217 = vmatprep.subr.mxu0 %v1346_v53 }
  0x27   : > { %1218 = vmatpush3.msra.mxu0 %v776_v60 }
  0x28   : > { %1162 = vmatmul.mubr.msk.f32.gmra.mxu0 %vm269_vm1, %v261_v11  ;;  %1219 = vmatprep.subr.mxu0 %v1346_v53 }
  0x29   : > { %1164 = vmatprep.mubr.msk.f32.mxu0 %vm269_vm1, %v262_v12  ;;  %1220 = vmatpush3.msra.mxu0 %v775_v61 }
  0x2c   : > { %1165 = vmatmul.mubr.msk.f32.gmra.mxu0 %vm269_vm1, %v263_v13 }
  0x2d   : > { %1167 = vmatprep.mubr.msk.f32.mxu0 %vm269_vm1, %v264_v14 }
  0x30   : > { %1168 = vmatmul.mubr.msk.f32.gmra.mxu0 %vm269_vm1, %v265_v15 }
  0x31   : > { %1170 = vmatprep.mubr.msk.f32.mxu0 %vm269_vm1, %v266_v16 }
  0x34   : > { %1171 = vmatmul.mubr.msk.f32.gmra.mxu0 %vm269_vm1, %v267_v17 }
  0x35   : > { %1221 = vmatprep.mubr.msk.f32.mxu0 %vm1347_vm3, %v1346_v53 }
  0xd8   : > { %v1151_v21 = vpop.f32.mrf.mxu0 }
  0xd9   : > { %v468_v24 = vmax.f32 %v1151_v21, 0.0 }
  0xda   : > { %v388_v22 = vpop.f32.mrf.mxu0 }
  0xdb   : > { %v467_v23 = vmax.f32 %v388_v22, 0.0 }
  0xdc   : > { %v1154_v25 = vpop.f32.mrf.mxu0 }
  0xdd   : > { %1181 = vmatprep.mubr.msk.f32.mxu1 %vm492_vm2, %v467_v23  ;;  %v470_v28 = vmax.f32 %v1154_v25, 0.0 }
  0xde   : > { %v398_v26 = vpop.f32.mrf.mxu0  ;;  %1182 = vmatmul.mubr.msk.f32.vlgmr.msra.gmra.mxu1 %vm492_vm2, %v468_v24 }
  0xdf   : > { %v469_v27 = vmax.f32 %v398_v26, 0.0  ;;  %1225 = vmatpush3.msra.mxu1 %v890_v62 }
  0xe0   : > { %v1157_v29 = vpop.f32.mrf.mxu0  ;;  %1226 = vmatprep.subr.mxu1 %v1346_v53 }
  0xe1   : > { %1184 = vmatprep.mubr.msk.f32.mxu1 %vm492_vm2, %v469_v27  ;;  %v472_v32 = vmax.f32 %v1157_v29, 0.0  ;;  %1227 = vmatpush3.msra.mxu1 %v889_v63 }
  0xe2   : > { %v408_v30 = vpop.f32.mrf.mxu0  ;;  %1185 = vmatmul.mubr.msk.f32.gmra.mxu1 %vm492_vm2, %v470_v28  ;;  %1228 = vmatprep.subr.mxu1 %v1346_v53 }
  0xe3   : > { %v471_v31 = vmax.f32 %v408_v30, 0.0  ;;  %1229 = vmatpush3.msra.mxu1 %v888_v0 }
  0xe4   : > { %v1160_v33 = vpop.f32.mrf.mxu0  ;;  %1230 = vmatprep.subr.mxu1 %v1346_v53 }
  0xe5   : > { %1187 = vmatprep.mubr.msk.f32.mxu1 %vm492_vm2, %v471_v31  ;;  %v474_v36 = vmax.f32 %v1160_v33, 0.0  ;;  %1231 = vmatpush3.msra.mxu1 %v887_v1 }
  0xe6   : > { %v418_v34 = vpop.f32.mrf.mxu0  ;;  %1188 = vmatmul.mubr.msk.f32.gmra.mxu1 %vm492_vm2, %v472_v32  ;;  %1232 = vmatprep.subr.mxu1 %v1346_v53 }
  0xe7   : > { %v473_v35 = vmax.f32 %v418_v34, 0.0  ;;  %1233 = vmatpush3.msra.mxu1 %v886_v2 }
  0xe8   : > { %v1163_v37 = vpop.f32.mrf.mxu0  ;;  %1234 = vmatprep.subr.mxu1 %v1346_v53 }
  0xe9   : > { %1190 = vmatprep.mubr.msk.f32.mxu1 %vm492_vm2, %v473_v35  ;;  %v476_v40 = vmax.f32 %v1163_v37, 0.0  ;;  %1235 = vmatpush3.msra.mxu1 %v885_v3 }
  0xea   : > { %v428_v38 = vpop.f32.mrf.mxu0  ;;  %1191 = vmatmul.mubr.msk.f32.gmra.mxu1 %vm492_vm2, %v474_v36  ;;  %1236 = vmatprep.subr.mxu1 %v1346_v53 }
  0xeb   : > { %v475_v39 = vmax.f32 %v428_v38, 0.0  ;;  %1237 = vmatpush3.msra.mxu1 %v884_v4 }
  0xec   : > { %v1166_v41 = vpop.f32.mrf.mxu0  ;;  %1238 = vmatprep.subr.mxu1 %v1346_v53 }
  0xed   : > { %1193 = vmatprep.mubr.msk.f32.mxu1 %vm492_vm2, %v475_v39  ;;  %v478_v44 = vmax.f32 %v1166_v41, 0.0 }
  0xee   : > { %v438_v42 = vpop.f32.mrf.mxu0  ;;  %1194 = vmatmul.mubr.msk.f32.gmra.mxu1 %vm492_vm2, %v476_v40 }
  0xef   : > { %v477_v43 = vmax.f32 %v438_v42, 0.0 }
  0xf0   : > { %v1169_v45 = vpop.f32.mrf.mxu0 }
  0xf1   : > { %1196 = vmatprep.mubr.msk.f32.mxu1 %vm492_vm2, %v477_v43  ;;  %v480_v48 = vmax.f32 %v1169_v45, 0.0 }
  0xf2   : > { %v448_v46 = vpop.f32.mrf.mxu0  ;;  %1197 = vmatmul.mubr.msk.f32.gmra.mxu1 %vm492_vm2, %v478_v44 }
  0xf3   : > { %v479_v47 = vmax.f32 %v448_v46, 0.0 }
  0xf4   : > { %v1172_v49 = vpop.f32.mrf.mxu0 }
  0xf5   : > { %1199 = vmatprep.mubr.msk.f32.mxu1 %vm492_vm2, %v479_v47  ;;  %v482_v52 = vmax.f32 %v1172_v49, 0.0 }
  0xf6   : > { %v458_v50 = vpop.f32.mrf.mxu0  ;;  %1200 = vmatmul.mubr.msk.f32.gmra.mxu1 %vm492_vm2, %v480_v48 }
  0xf7   : > { %v481_v51 = vmax.f32 %v458_v50, 0.0 }
  0xf9   : > { %1202 = vmatprep.mubr.msk.f32.mxu1 %vm492_vm2, %v481_v51 }
  0xfa   : > { %1203 = vmatmul.mubr.msk.f32.gmra.mxu1 %vm492_vm2, %v482_v52 }
  0xfb   : > { %1240 = vmatprep.mubr.msk.f32.mxu1 %vm1347_vm3, %v1346_v53 }
 0x19e   : > { %v1183_v5 = vpop.f32.mrf.mxu1 }
 0x19f   : > { %v613_v14 = vadd.f32 %v1183_v5, %v1549_v8 }
 0x1a0   : > { %v607_v6 = vpop.f32.mrf.mxu1 }
 0x1a1   : > { %v608_v9 = vadd.f32 %v1549_v8, %v607_v6  ;;  %v687_v23 = vmax.f32 %v613_v14, 0.0 }
 0x1a2   : > { %v1186_v7 = vpop.f32.mrf.mxu1 }
 0x1a3   : > { %v623_v11 = vadd.f32 %v1186_v7, %v1549_v8  ;;  %v686_v17 = vmax.f32 %v608_v9, 0.0  ;;  %v704_v36 = vsel %vm702_vm4, %v687_v23, -inf }
 0x1a4   : > { %v617_v10 = vpop.f32.mrf.mxu1 }
 0x1a5   : > { %v618_v12 = vadd.f32 %v1549_v8, %v617_v10  ;;  %v689_v19 = vmax.f32 %v623_v11, 0.0  ;;  %v703_v27 = vsel %vm702_vm4, %v686_v17, -inf }
 0x1a6   : > { %v1189_v13 = vpop.f32.mrf.mxu1  ;;  %v705_v40 = vmax.f32 %v703_v27, %v704_v36 }
 0x1a7   : > { %v688_v15 = vmax.f32 %v618_v12, 0.0  ;;  %v633_v16 = vadd.f32 %v1189_v13, %v1549_v8  ;;  %v713_v29 = vsel %vm702_vm4, %v689_v19, -inf }
 0x1a8   : > { %v627_v18 = vpop.f32.mrf.mxu1  ;;  %v706_v52 = vrot.slane %v705_v40, 4 }
 0x1a9   : > { %v628_v20 = vadd.f32 %v1549_v8, %v627_v18  ;;  %v691_v21 = vmax.f32 %v633_v16, 0.0  ;;  %v712_v24 = vsel %vm702_vm4, %v688_v15, -inf }
 0x1aa   : > { %v1192_v22 = vpop.f32.mrf.mxu1  ;;  %v714_v33 = vmax.f32 %v712_v24, %v713_v29  ;;  %v707_v1 = vmax.f32 %v705_v40, %v706_v52 }
 0x1ab   : > { %v690_v25 = vmax.f32 %v628_v20, 0.0  ;;  %v643_v26 = vadd.f32 %v1192_v22, %v1549_v8  ;;  %v722_v34 = vsel %vm702_vm4, %v691_v21, -inf }
 0x1ac   : > { %v637_v28 = vpop.f32.mrf.mxu1  ;;  %v715_v46 = vrot.slane %v714_v33, 4  ;;  %v708_v17 = vrot.slane %v707_v1, 2 }
 0x1ad   : > { %v721_v30 = vsel %vm702_vm4, %v690_v25, -inf  ;;  %v693_v31 = vmax.f32 %v643_v26, 0.0  ;;  %v638_v32 = vadd.f32 %v1549_v8, %v637_v28 }
 0x1ae   : > { %v1195_v35 = vpop.f32.mrf.mxu1  ;;  %v723_v37 = vmax.f32 %v721_v30, %v722_v34  ;;  %v716_v59 = vmax.f32 %v714_v33, %v715_v46 }
 0x1af   : > { %v692_v38 = vmax.f32 %v638_v32, 0.0  ;;  %v653_v39 = vadd.f32 %v1195_v35, %v1549_v8  ;;  %v731_v42 = vsel %vm702_vm4, %v693_v31, -inf  ;;  %v709_v31 = vmax.f32 %v707_v1, %v708_v17 }
 0x1b0   : > { %v647_v41 = vpop.f32.mrf.mxu1  ;;  %v724_v49 = vrot.slane %v723_v37, 4  ;;  %v717_v10 = vrot.slane %v716_v59, 2 }
 0x1b1   : > { %v730_v43 = vsel %vm702_vm4, %v692_v38, -inf  ;;  %v695_v44 = vmax.f32 %v653_v39, 0.0  ;;  %v648_v45 = vadd.f32 %v1549_v8, %v647_v41 }
 0x1b2   : > { %v732_v47 = vmax.f32 %v730_v43, %v731_v42  ;;  %v1198_v48 = vpop.f32.mrf.mxu1  ;;  %v725_v62 = vmax.f32 %v723_v37, %v724_v49  ;;  %v718_v26 = vmax.f32 %v716_v59, %v717_v10 }
 0x1b3   : > { %v694_v50 = vmax.f32 %v648_v45, 0.0  ;;  %v663_v51 = vadd.f32 %v1198_v48, %v1549_v8  ;;  %v740_v55 = vsel %vm702_vm4, %v695_v44, -inf }
 0x1b4   : > { %v733_v53 = vrot.slane %v732_v47, 4  ;;  %v657_v54 = vpop.f32.mrf.mxu1  ;;  %v726_v14 = vrot.slane %v725_v62, 2  ;;  %v719_v38 = vrot.slane %v718_v26, 1 }
 0x1b5   : > { %v739_v56 = vsel %vm702_vm4, %v694_v50, -inf  ;;  %v697_v57 = vmax.f32 %v663_v51, 0.0  ;;  %v658_v58 = vadd.f32 %v1549_v8, %v657_v54 }
 0x1b6   : > { %v741_v60 = vmax.f32 %v739_v56, %v740_v55  ;;  %v1201_v61 = vpop.f32.mrf.mxu1  ;;  %v734_v2 = vmax.f32 %v732_v47, %v733_v53  ;;  %v727_v29 = vmax.f32 %v725_v62, %v726_v14  ;;  %v720_v47 = vmax.f32 %v718_v26, %v719_v38 }
 0x1b7   : > { %v696_v63 = vmax.f32 %v658_v58, 0.0  ;;  %v673_v0 = vadd.f32 %v1201_v61, %v1549_v8  ;;  %v749_v5 = vsel %vm702_vm4, %v697_v57, -inf }
 0x1b8   : > { %v742_v3 = vrot.slane %v741_v60, 4  ;;  %v667_v4 = vpop.f32.mrf.mxu1  ;;  %v735_v18 = vrot.slane %v734_v2, 2  ;;  %v728_v42 = vrot.slane %v727_v29, 1 }
 0x1b9   : > { %v748_v6 = vsel %vm702_vm4, %v696_v63, -inf  ;;  %v699_v7 = vmax.f32 %v673_v0, 0.0  ;;  %v668_v9 = vadd.f32 %v1549_v8, %v667_v4 }
 0x1ba   : > { %v743_v11 = vmax.f32 %v741_v60, %v742_v3  ;;  %v750_v12 = vmax.f32 %v748_v6, %v749_v5  ;;  %v1204_v13 = vpop.f32.mrf.mxu1  ;;  %v736_v32 = vmax.f32 %v734_v2, %v735_v18  ;;  %v729_v51 = vmax.f32 %v727_v29, %v728_v42  ;;  %v883_v5 = vld [vmem:[%s1638_s4] sm:$0xff] }
 0x1bb   : > { %v698_v15 = vmax.f32 %v668_v9, 0.0  ;;  %v683_v16 = vadd.f32 %v1204_v13, %v1549_v8  ;;  %v758_v20 = vsel %vm702_vm4, %v699_v7, -inf  ;;  %1239 = vmatpush3.msra.mxu1 %v883_v5  ;;  %v1084_v6 = vld [vmem:[%s1639_s5 + $0x1] ss:$0 sm:$0xff] }
 0x1bc   : > { %v751_v19 = vrot.slane %v750_v12, 4  ;;  %v677_v21 = vpop.f32.mrf.mxu1  ;;  %v744_v22 = vrot.slane %v743_v11, 2  ;;  %v737_v43 = vrot.slane %v736_v32, 1 }
 0x1bd   : > { %v757_v23 = vsel %vm702_vm4, %v698_v15, -inf  ;;  %v701_v24 = vmax.f32 %v683_v16, 0.0  ;;  %v678_v25 = vadd.f32 %v1549_v8, %v677_v21  ;;  %v710_v8 = vrot.slane %v709_v31, 1 }
 0x1be   : > { %v752_v27 = vmax.f32 %v750_v12, %v751_v19  ;;  %v759_v28 = vmax.f32 %v757_v23, %v758_v20  ;;  %v745_v35 = vmax.f32 %v743_v11, %v744_v22  ;;  %v738_v53 = vmax.f32 %v736_v32, %v737_v43  ;;  %v1086_v12 = vld [vmem:[%s1639_s5 + $0x2] ss:$0 sm:$0xff] }
 0x1bf   : > { %v700_v30 = vmax.f32 %v678_v25, 0.0  ;;  %v767_v36 = vsel %vm702_vm4, %v701_v24, -inf  ;;  %v711_v52 = vmax.f32 %v709_v31, %v710_v8 }
 0x1c0   : > { %v753_v33 = vrot.slane %v752_v27, 2  ;;  %v760_v34 = vrot.slane %v759_v28, 4  ;;  %v746_v46 = vrot.slane %v745_v35, 1 }
 0x1c1   : > { %v766_v37 = vsel %vm702_vm4, %v700_v30, -inf  ;;  %v797_v57 = vsel %vm796_vm5, %v720_v47, %v711_v52 }
 0x1c2   : > { %v754_v39 = vmax.f32 %v752_v27, %v753_v33  ;;  %v761_v40 = vmax.f32 %v759_v28, %v760_v34  ;;  %v768_v41 = vmax.f32 %v766_v37, %v767_v36  ;;  %v747_v56 = vmax.f32 %v745_v35, %v746_v46 }
 0x1c3   : > { %v799_v60 = vsel %vm798_vm6, %v729_v51, %v797_v57 }
 0x1c4   : > { %v762_v44 = vrot.slane %v761_v40, 2  ;;  %v769_v45 = vrot.slane %v768_v41, 4  ;;  %v755_v48 = vrot.slane %v754_v39, 1  ;;  %v801_v62 = vsel %vm800_vm7, %v738_v53, %v799_v60 }
 0x1c5   : > { %v803_v0 = vsel %vm802_vm8, %v747_v56, %v801_v62 }
 0x1c6   : > { %v763_v49 = vmax.f32 %v761_v40, %v762_v44  ;;  %v770_v50 = vmax.f32 %v768_v41, %v769_v45  ;;  %v756_v58 = vmax.f32 %v754_v39, %v755_v48 }
 0x1c8   : > { %v764_v54 = vrot.slane %v763_v49, 1  ;;  %v771_v55 = vrot.slane %v770_v50, 2  ;;  %v805_v2 = vsel %vm804_vm9, %v756_v58, %v803_v0 }
 0x1ca   : > { %v772_v59 = vmax.f32 %v770_v50, %v771_v55  ;;  %v765_v61 = vmax.f32 %v763_v49, %v764_v54 }
 0x1cc   : > { %v773_v63 = vrot.slane %v772_v59, 1  ;;  %v807_v3 = vsel %vm806_vm10, %v765_v61, %v805_v2 }
 0x1ce   : > { %v774_v1 = vmax.f32 %v772_v59, %v773_v63 }
 0x1d0   : > { %v809_v4 = vsel %vm808_vm11, %v774_v1, %v807_v3 }
 0x1d1   : > { %1222 = vmatmul.mubr.msk.f32.vlgmr.msra.gmra.mxu0 %vm702_vm4, %v809_v4 }
 0x291   : > { %v878_v7 = vpop.f32.mrf.mxu0 }
 0x292   : > { %v879_v9 = vadd.f32 %v1084_v6, %v878_v7 }
 0x293   : > { %v1223_v10 = vpop.f32.mrf.mxu0 }
 0x294   : > { %v882_v11 = vmax.f32 %v879_v9, 0.0 }
 0x296   : > { %1241 = vmatmul.mubr.msk.f32.vlgmr.msra.gmra.mxu1 %vm702_vm4, %v882_v11 }
 0x356   : > { %v965_v13 = vpop.f32.mrf.mxu1 }
 0x357   : > { %v966_v14 = vadd.f32 %v1086_v12, %v965_v13 }
 0x358   : > { %v1242_v15 = vpop.f32.mrf.mxu1 }
 0x359   : > { %969 = vst [vmem:[%s245_s20] sm:$0xff] %v966_v14 }
 0x35a   : > { %1297 = shalt.err (!%p1294_p3)
}
 0x35b   : > { %s1298_s14 = scalar_lea.hbm %s1599_s9, 128  ;;  %s1302_s17 = scalar_lea.hbm %s1640_s6, 256 }
 0x35c   : > { %p1299_p4 = scmp.ne.s32.totalorder %s1599_s9, %s1298_s14  ;;  %p1303_p9 = scmp.lt.s32.totalorder %s1599_s9, %s1640_s6 }
 0x35d   : > { %p1304_p10 = scmp.lt.s32.totalorder %s1302_s17, %s1298_s14 }
 0x35e   : > { %p1300_p7 = pnand %p1299_p4, %p1422_p5 }
 0x35f   : > { %p1305_p11 = por %p1304_p10, %p1303_p9 }
 0x360   : > { %p1301_p8 = pneg %p1300_p7 }
 0x362   : > { %p1306_p12 = pnand %p1305_p11, %p1301_p8 }
 0x364   : > { %1309 = shalt.err (!%p1306_p12)
}
 0x365   : > { %1243 = dma.vmem_to_hbm [thread:$0]  (%p1422_p5), %s985_s26, 128, %s1599_s9, %s971_s10  }
 0x366 PF: > { %p1249_p13 = scmp.ge.s32.totalorder %s1344_s24, 2  ;;  %s996_s20 = sand.u32 1, %s1332_s21  }
 0x367   : > { %s997_s28 = scalar_lea.sflag [#allocation3], %s996_s20 }
 0x368   : > { %p1246_p0 = pnand %p1249_p13, %p1426_p6 }
 0x36a   : > { %p1247_p1 = pneg %p1246_p0 }
 0x36c   : > { %1327 = dma.done.wait (%p1247_p1), %s997_s28, 128  }
 0x36d   : > { %1329 = vsyncadd (%p1247_p1), %s997_s28, 4294967168  ;;  %p16_p2 = scmp.ge.s32.totalorder %s1409_s27, 4   ;;  %s1643_s21 = smov %s1336_s22 }
 0x36e   : > { %s1644_s22 = smov %s1340_s23  ;;  %s1645_s23 = smov %s1420_s30 }
 0x36f   : > { %s1646_s24 = smov %s1409_s27  ;;  %18 = sbr.rel (!%p16_p2) target bundleno = 3 (0x3), region = 79 }
 0x374   :  { %1002 = vsyncpa [#allocation3], 1 }
 0x375   :  { %1004 = vsyncpa [#allocation3 + $0x1], 1 }

</bundles_post_ra>
